<compile_context>
chip_gen: v6e
topology: v6e:2x2x1
jax: 0.10.0
libtpu: 0.0.40
codegen_flags: <defaults>
</compile_context>

<pallas_src>
import math
import numpy as np
import jax
import jax.numpy as jnp
from jax.experimental import pallas as pl
from jax.experimental.pallas import tpu as pltpu

EPS = 1e-8  # stable_angle epsilon


# ----------------------------------------------------------------------------
# Pallas kernel: fused complex matmul + polar bias via rotation identity.
# ----------------------------------------------------------------------------
def _complex_conv_kernel(p_ref, w_ref, mb_ref, cpb_ref, spb_ref, or_ref, oi_ref):
    # p_ref  : (2*Kd_pad, TILE_M)   stacked [Pr ; Pi] patches, M on lanes
    # w_ref  : (2*Co_pad, 2*Kd_pad) resident [[Wr, -Wi], [Wi, Wr]]
    # mb/cpb/spb : (Co_pad, 1)      magnitude bias, cos/sin of phase bias
    # or/oi  : (Co_pad, TILE_M)     real / imag output planes
    co = or_ref.shape[0]

    # One MXU call computes both the real and imaginary conv outputs.
    acc = jnp.dot(w_ref[...], p_ref[...],
                  preferred_element_type=jnp.float32,
                  precision=jax.lax.Precision.HIGHEST)
    re = acc[:co, :]
    im = acc[co:, :]

    # magnitude + magnitude bias (|z| uses the UNclamped imaginary part)
    mag = jnp.sqrt(re * re + im * im) + mb_ref[...]

    # stable_angle clamp: tiny imaginary parts -> +EPS (matches reference)
    im_s = jnp.where((im < EPS) & (im > -EPS), EPS, im)

    # rotation identity replaces atan2/cos/sin:
    #   out = mag * (z_s / |z_s|) * (cos(pb) + i*sin(pb))
    inv_rs = jax.lax.rsqrt(re * re + im_s * im_s)   # |z_s| >= EPS, never 0
    scale = mag * inv_rs
    cpb = cpb_ref[...]
    spb = spb_ref[...]
    or_ref[...] = scale * (re * cpb - im_s * spb)
    oi_ref[...] = scale * (im_s * cpb + re * spb)


# ----------------------------------------------------------------------------
# Glue: transposed im2col (pure JAX), lane-friendly padding, pallas_call.
# ----------------------------------------------------------------------------
def _im2col_t(x, K, stride, padding):
    """x: (N, C, H, W) real plane -> patches (C*K*K, N*Hout*Wout), Hout, Wout.

    Row order of the Kd axis is (c_in, kh, kw), matching the PyTorch OIHW
    weight flattening; column order of the M axis is (n, h_out, w_out).
    """
    N, C, H, W = x.shape
    xp = jnp.pad(x, ((0, 0), (0, 0), (padding, padding), (padding, padding)))
    Hp, Wp = H + 2 * padding, W + 2 * padding
    Hout = (Hp - K) // stride + 1
    Wout = (Wp - K) // stride + 1
    cols = []
    for kh in range(K):
        for kw in range(K):
            cols.append(xp[:, :, kh:kh + stride * Hout:stride,
                               kw:kw + stride * Wout:stride])
    p = jnp.stack(cols, axis=2)                 # (N, C, K*K, Hout, Wout)
    p = p.transpose(1, 2, 0, 3, 4)              # (C, K*K, N, Hout, Wout)
    return p.reshape(C * K * K, N * Hout * Wout), Hout, Wout


def _round_up(v, m):
    return ((v + m - 1) // m) * m


def complex_conv2d(x, w, magnitude_bias, phase_bias, *, stride, padding,
                   tile_m=1024):
    """x: (N, Cin, H, W) complex64; w: (Cout, Cin, K, K) complex64;
    magnitude_bias / phase_bias: (Cout,) float32.  Returns NCHW complex64."""
    Nb, Cin, H, W = x.shape
    Cout, _, K, _ = w.shape

    xr = jnp.real(x).astype(jnp.float32)
    xi = jnp.imag(x).astype(jnp.float32)
    pr, Hout, Wout = _im2col_t(xr, K, stride, padding)
    pi, _, _ = _im2col_t(xi, K, stride, padding)

    M = Nb * Hout * Wout
    Kd = Cin * K * K
    Kd_pad = _round_up(Kd, 8)       # tiny contraction dim on sublanes: pad to 8
    Co_pad = _round_up(Cout, 8)     # tiny channel dim on sublanes: pad to 8

    # lane-dense tile of M, always a multiple of 128
    TILE_M = min(_round_up(tile_m, 128), _round_up(M, 128))
    M_pad = _round_up(M, TILE_M)
    grid = (M_pad // TILE_M,)

    # zero-pad (zeros do not perturb the dot) and stack real over imag
    pr = jnp.pad(pr, ((0, Kd_pad - Kd), (0, M_pad - M)))
    pi = jnp.pad(pi, ((0, Kd_pad - Kd), (0, M_pad - M)))
    patches = jnp.concatenate([pr, pi], axis=0)            # (2*Kd_pad, M_pad)

    # Real block-matrix form of the complex weight: [[Wr, -Wi], [Wi, Wr]]
    wr = jnp.real(w).astype(jnp.float32).reshape(Cout, Kd)
    wi = jnp.imag(w).astype(jnp.float32).reshape(Cout, Kd)
    wb = jnp.zeros((2 * Co_pad, 2 * Kd_pad), jnp.float32)
    wb = wb.at[:Cout, :Kd].set(wr)
    wb = wb.at[:Cout, Kd_pad:Kd_pad + Kd].set(-wi)
    wb = wb.at[Co_pad:Co_pad + Cout, :Kd].set(wi)
    wb = wb.at[Co_pad:Co_pad + Cout, Kd_pad:Kd_pad + Kd].set(wr)

    mb = jnp.pad(magnitude_bias.astype(jnp.float32), (0, Co_pad - Cout))
    pb = jnp.pad(phase_bias.astype(jnp.float32), (0, Co_pad - Cout))
    mb = mb.reshape(Co_pad, 1)
    cpb = jnp.cos(pb).reshape(Co_pad, 1)
    spb = jnp.sin(pb).reshape(Co_pad, 1)

    cost = pl.CostEstimate(
        flops=2 * (2 * Co_pad) * (2 * Kd_pad) * M_pad + 12 * Co_pad * M_pad,
        transcendentals=2 * Co_pad * M_pad,
        bytes_accessed=4 * (2 * Kd_pad * M_pad            # patches in
                            + 2 * Co_pad * M_pad          # outputs out
                            + 4 * Co_pad * Kd_pad         # weights
                            + 3 * Co_pad),                # biases
    )

    out_re, out_im = pl.pallas_call(
        _complex_conv_kernel,
        out_shape=(jax.ShapeDtypeStruct((Co_pad, M_pad), jnp.float32),
                   jax.ShapeDtypeStruct((Co_pad, M_pad), jnp.float32)),
        grid=grid,
        in_specs=[
            pl.BlockSpec((2 * Kd_pad, TILE_M), lambda i: (0, i)),      # patches
            pl.BlockSpec((2 * Co_pad, 2 * Kd_pad), lambda i: (0, 0)),  # weights
            pl.BlockSpec((Co_pad, 1), lambda i: (0, 0)),               # mag bias
            pl.BlockSpec((Co_pad, 1), lambda i: (0, 0)),               # cos(pb)
            pl.BlockSpec((Co_pad, 1), lambda i: (0, 0)),               # sin(pb)
        ],
        out_specs=(pl.BlockSpec((Co_pad, TILE_M), lambda i: (0, i)),
                   pl.BlockSpec((Co_pad, TILE_M), lambda i: (0, i))),
        compiler_params=pltpu.CompilerParams(
            dimension_semantics=("parallel",)),
        cost_estimate=cost,
    )(patches, wb, mb, cpb, spb)

    out = (out_re[:Cout, :M] + 1j * out_im[:Cout, :M]).astype(jnp.complex64)
    out = out.reshape(Cout, Nb, Hout, Wout).transpose(1, 0, 2, 3)   # -> NCHW
    return out


# ----------------------------------------------------------------------------
# Pure-JAX reference (mirrors the PyTorch forward exactly).
# ----------------------------------------------------------------------------
def _reference(x, w, magnitude_bias, phase_bias, *, stride, padding):
    hi = jax.lax.Precision.HIGHEST

    def conv(a, b):
        return jax.lax.conv_general_dilated(
            a, b, window_strides=(stride, stride),
            padding=((padding, padding), (padding, padding)),
            dimension_numbers=('NCHW', 'OIHW', 'NCHW'), precision=hi)

    xr, xi = jnp.real(x).astype(jnp.float32), jnp.imag(x).astype(jnp.float32)
    wr = jnp.real(w).astype(jnp.float32)
    wi = jnp.imag(w).astype(jnp.float32)
    yr = conv(xr, wr) - conv(xi, wi)
    yi = conv(xr, wi) + conv(xi, wr)
    mb = magnitude_bias[None, :, None, None]
    pb = phase_bias[None, :, None, None]
    mag = jnp.sqrt(yr * yr + yi * yi) + mb
    yi_s = jnp.where((yi < EPS) & (yi > -EPS), EPS, yi)
    phase = jnp.arctan2(yi_s, yr) + pb
    return (mag * jnp.exp(1j * phase)).astype(jnp.complex64)


# ----------------------------------------------------------------------------
# Deterministic parameter init (mirrors the PyTorch __init__ semantics).
# ----------------------------------------------------------------------------
def init_params(key, in_channels, out_channels, kernel_size,
                phase_init_min=-math.pi, phase_init_max=math.pi):
    k_mag, k_phase, k_bias = jax.random.split(key, 3)
    shape = (out_channels, in_channels, kernel_size, kernel_size)
    fan_in = in_channels * kernel_size ** 2
    w_scale = 1.0 / math.sqrt(fan_in)
    # Rayleigh(scale) sample via inverse CDF
    u = jax.random.uniform(k_mag, shape, minval=1e-7, maxval=1.0)
    w_mag = w_scale * jnp.sqrt(-2.0 * jnp.log(u))
    w_phase = jax.random.uniform(k_phase, shape,
                                 minval=phase_init_min, maxval=phase_init_max)
    w = (w_mag * jnp.cos(w_phase) + 1j * w_mag * jnp.sin(w_phase)).astype(jnp.complex64)
    bound = 1.0 / math.sqrt(fan_in)
    magnitude_bias = jax.random.uniform(k_bias, (out_channels,),
                                        minval=-bound, maxval=bound,
                                        dtype=jnp.float32)
    phase_bias = jnp.zeros((out_channels,), jnp.float32)
    return w, magnitude_bias, phase_bias


if __name__ == "__main__":
    # Small, PyTorch-consistent shapes: N=2, Cin=4, H=W=16, Cout=8, K=3, s=1, p=1
    N, Cin, H, W = 2, 4, 16, 16
    Cout, K, stride, padding = 8, 3, 1, 1

    key = jax.random.PRNGKey(0)
    k_w, k_xr, k_xi, k_pb = jax.random.split(key, 4)
    w, mag_bias, ph_bias = init_params(k_w, Cin, Cout, K)
    # Use a non-zero phase bias to exercise the in-kernel rotation identity
    # (the module's default init is zero; forward semantics are unchanged).
    ph_bias = jax.random.uniform(k_pb, (Cout,), minval=-math.pi, maxval=math.pi,
                                 dtype=jnp.float32)

    xr = jax.random.normal(k_xr, (N, Cin, H, W), jnp.float32)
    xi = jax.random.normal(k_xi, (N, Cin, H, W), jnp.float32)
    x = (xr + 1j * xi).astype(jnp.complex64)

    # tile_m=256 -> M = 2*16*16 = 512 rows split over a 2-step pipelined grid.
    out = complex_conv2d(x, w, mag_bias, ph_bias, stride=stride,
                         padding=padding, tile_m=256)
    out = jax.block_until_ready(out)

    ref = _reference(x, w, mag_bias, ph_bias, stride=stride, padding=padding)
    np.testing.assert_allclose(np.asarray(out), np.asarray(ref),
                               rtol=1e-3, atol=1e-4)
    print("KERNEL_OK")
</pallas_src>

<mosaic_0001>
module attributes {stable_mosaic.version = 11 : i64} {
  func.func @_complex_conv_kernel(%arg0: i32, %arg1: memref<80x256xf32, #tpu.memory_space<vmem>>, %arg2: memref<16x80xf32, #tpu.memory_space<vmem>>, %arg3: memref<8x1xf32, #tpu.memory_space<vmem>>, %arg4: memref<8x1xf32, #tpu.memory_space<vmem>>, %arg5: memref<8x1xf32, #tpu.memory_space<vmem>>, %arg6: memref<8x256xf32, #tpu.memory_space<vmem>>, %arg7: memref<8x256xf32, #tpu.memory_space<vmem>>) attributes {dimension_semantics = [#tpu.dimension_semantics<parallel>], iteration_bounds = array<i64: 2>, scalar_prefetch = 0 : i64, scratch_operands = 0 : i64, tpu.core_type = #tpu.core_type<tc>, window_params = [{transform_indices = @transform_0, window_bounds = array<i64: 80, 256>}, {pipeline_mode = #tpu.pipeline_mode<synchronous>, transform_indices = @transform_1, window_bounds = array<i64: 16, 80>}, {pipeline_mode = #tpu.pipeline_mode<synchronous>, transform_indices = @transform_2, window_bounds = array<i64: 8, 1>}, {pipeline_mode = #tpu.pipeline_mode<synchronous>, transform_indices = @transform_3, window_bounds = array<i64: 8, 1>}, {pipeline_mode = #tpu.pipeline_mode<synchronous>, transform_indices = @transform_4, window_bounds = array<i64: 8, 1>}, {transform_indices = @transform_5, window_bounds = array<i64: 8, 256>}, {transform_indices = @transform_6, window_bounds = array<i64: 8, 256>}]} {
    %c0 = arith.constant 0 : index
    %c0_0 = arith.constant 0 : index
    %0 = vector.load %arg2[%c0, %c0_0] : memref<16x80xf32, #tpu.memory_space<vmem>>, vector<16x80xf32>
    %c0_1 = arith.constant 0 : index
    %c0_2 = arith.constant 0 : index
    %1 = vector.load %arg1[%c0_1, %c0_2] : memref<80x256xf32, #tpu.memory_space<vmem>>, vector<80x256xf32>
    %cst = arith.constant dense<0.000000e+00> : vector<16x256xf32>
    %2 = tpu.matmul %0, %1, %cst {dimension_numbers = #tpu.dot_dimension_numbers<[1], [0], [0], [1], [0, 0, 1, 1], [], []>, precision = #tpu.contract_precision<fp32>} : vector<16x80xf32>, vector<80x256xf32>, vector<16x256xf32> -> vector<16x256xf32>
    %3 = vector.extract_strided_slice %2 {offsets = [0, 0], sizes = [8, 256], strides = [1, 1]} : vector<16x256xf32> to vector<8x256xf32>
    %4 = vector.extract_strided_slice %2 {offsets = [8, 0], sizes = [8, 256], strides = [1, 1]} : vector<16x256xf32> to vector<8x256xf32>
    %5 = arith.mulf %3, %3 : vector<8x256xf32>
    %6 = arith.mulf %4, %4 : vector<8x256xf32>
    %7 = arith.addf %5, %6 : vector<8x256xf32>
    %8 = math.sqrt %7 : vector<8x256xf32>
    %c0_3 = arith.constant 0 : index
    %c0_4 = arith.constant 0 : index
    %9 = vector.load %arg3[%c0_3, %c0_4] : memref<8x1xf32, #tpu.memory_space<vmem>>, vector<8x1xf32>
    %10 = vector.broadcast %9 : vector<8x1xf32> to vector<8x256xf32>
    %11 = arith.addf %8, %10 : vector<8x256xf32>
    %cst_5 = arith.constant 9.99999993E-9 : f32
    %12 = vector.broadcast %cst_5 : f32 to vector<8x256xf32>
    %13 = arith.cmpf olt, %4, %12 : vector<8x256xf32>
    %cst_6 = arith.constant -9.99999993E-9 : f32
    %14 = vector.broadcast %cst_6 : f32 to vector<8x256xf32>
    %15 = arith.cmpf ogt, %4, %14 : vector<8x256xf32>
    %16 = arith.andi %13, %15 : vector<8x256xi1>
    %cst_7 = arith.constant 9.99999993E-9 : f32
    %17 = vector.broadcast %cst_7 : f32 to vector<8x256xf32>
    %18 = arith.select %16, %17, %4 : vector<8x256xi1>, vector<8x256xf32>
    %19 = arith.mulf %3, %3 : vector<8x256xf32>
    %20 = arith.mulf %18, %18 : vector<8x256xf32>
    %21 = arith.addf %19, %20 : vector<8x256xf32>
    %22 = math.rsqrt %21 : vector<8x256xf32>
    %23 = arith.mulf %11, %22 : vector<8x256xf32>
    %c0_8 = arith.constant 0 : index
    %c0_9 = arith.constant 0 : index
    %24 = vector.load %arg4[%c0_8, %c0_9] : memref<8x1xf32, #tpu.memory_space<vmem>>, vector<8x1xf32>
    %c0_10 = arith.constant 0 : index
    %c0_11 = arith.constant 0 : index
    %25 = vector.load %arg5[%c0_10, %c0_11] : memref<8x1xf32, #tpu.memory_space<vmem>>, vector<8x1xf32>
    %26 = vector.broadcast %24 : vector<8x1xf32> to vector<8x256xf32>
    %27 = arith.mulf %3, %26 : vector<8x256xf32>
    %28 = vector.broadcast %25 : vector<8x1xf32> to vector<8x256xf32>
    %29 = arith.mulf %18, %28 : vector<8x256xf32>
    %30 = arith.subf %27, %29 : vector<8x256xf32>
    %31 = arith.mulf %23, %30 : vector<8x256xf32>
    %c0_12 = arith.constant 0 : index
    %c0_13 = arith.constant 0 : index
    %32 = vector.load %arg6[%c0_12, %c0_13] : memref<8x256xf32, #tpu.memory_space<vmem>>, vector<8x256xf32>
    tpu.vector_store %arg6[%c0_12, %c0_13], %31 {strides = array<i32>} : memref<8x256xf32, #tpu.memory_space<vmem>>, vector<8x256xf32>,
    %33 = vector.broadcast %24 : vector<8x1xf32> to vector<8x256xf32>
    %34 = arith.mulf %18, %33 : vector<8x256xf32>
    %35 = vector.broadcast %25 : vector<8x1xf32> to vector<8x256xf32>
    %36 = arith.mulf %3, %35 : vector<8x256xf32>
    %37 = arith.addf %34, %36 : vector<8x256xf32>
    %38 = arith.mulf %23, %37 : vector<8x256xf32>
    %c0_14 = arith.constant 0 : index
    %c0_15 = arith.constant 0 : index
    %39 = vector.load %arg7[%c0_14, %c0_15] : memref<8x256xf32, #tpu.memory_space<vmem>>, vector<8x256xf32>
    tpu.vector_store %arg7[%c0_14, %c0_15], %38 {strides = array<i32>} : memref<8x256xf32, #tpu.memory_space<vmem>>, vector<8x256xf32>,
    return
  }
  func.func @transform_0(%arg0: i32) -> (i32, i32) {
    %c0_i32 = arith.constant 0 : i32
    %c0_i32_0 = arith.constant 0 : i32
    return %c0_i32, %arg0 : i32, i32
  }
  func.func @transform_1(%arg0: i32) -> (i32, i32) {
    %c0_i32 = arith.constant 0 : i32
    %c0_i32_0 = arith.constant 0 : i32
    %c0_i32_1 = arith.constant 0 : i32
    return %c0_i32, %c0_i32_0 : i32, i32
  }
  func.func @transform_2(%arg0: i32) -> (i32, i32) {
    %c0_i32 = arith.constant 0 : i32
    %c0_i32_0 = arith.constant 0 : i32
    %c0_i32_1 = arith.constant 0 : i32
    return %c0_i32, %c0_i32_0 : i32, i32
  }
  func.func @transform_3(%arg0: i32) -> (i32, i32) {
    %c0_i32 = arith.constant 0 : i32
    %c0_i32_0 = arith.constant 0 : i32
    %c0_i32_1 = arith.constant 0 : i32
    return %c0_i32, %c0_i32_0 : i32, i32
  }
  func.func @transform_4(%arg0: i32) -> (i32, i32) {
    %c0_i32 = arith.constant 0 : i32
    %c0_i32_0 = arith.constant 0 : i32
    %c0_i32_1 = arith.constant 0 : i32
    return %c0_i32, %c0_i32_0 : i32, i32
  }
  func.func @transform_5(%arg0: i32) -> (i32, i32) {
    %c0_i32 = arith.constant 0 : i32
    %c0_i32_0 = arith.constant 0 : i32
    return %c0_i32, %arg0 : i32, i32
  }
  func.func @transform_6(%arg0: i32) -> (i32, i32) {
    %c0_i32 = arith.constant 0 : i32
    %c0_i32_0 = arith.constant 0 : i32
    return %c0_i32, %arg0 : i32, i32
  }
}

</mosaic_0001>

<bundles_post_ra>
// kernel: tpu_custom_call.1
= control target key start
LH: loop header
LB: loop body
LE: loop exit
PB: predicated region body
PF: predicated region fallthrough
CT: control target
= control target key end

     0   :  { %12 = vsyncpa [#allocation3], 0  ;;  %s2137_s0 = inlined_call_operand.hbm [shape: f32[80,512], index: 0, kind: input, shape index: {}]   ;;  %s2138_s1 = inlined_call_operand.vmem [shape: f32[16,80], index: 1, kind: input, shape index: {}]   ;;  %s2139_s2 = inlined_call_operand.vmem [shape: f32[8,1], index: 2, kind: input, shape index: {}]   ;;  %s2140_s3 = inlined_call_operand.vmem [shape: f32[8,1], index: 3, kind: input, shape index: {}]   ;;  %s2141_s4 = inlined_call_operand.vmem [shape: f32[8,1], index: 4, kind: input, shape index: {}]   ;;  %s2142_s5 = inlined_call_operand.hbm [shape: f32[8,512], index: 5, kind: output, shape index: {0}]   ;;  %s2143_s6 = inlined_call_operand.hbm [shape: f32[8,512], index: 6, kind: output, shape index: {1}]  }
   0x1   :  { %14 = vsyncpa [#allocation3 + $0x1], 0 }
   0x2   :  { %15 = vsyncpa [#allocation4], 0 }
   0x3   :  { %17 = vsyncpa [#allocation4 + $0x1], 0 }
   0x4   :  { %18 = vsyncpa [#allocation7], 0 }
   0x5   :  { %20 = vsyncpa [#allocation7 + $0x1], 0  ;;  %s1527_s21 = smov 0   ;;  %s1529_s22 = smov 0  }
   0x6   :  { %s1531_s23 = smov 0   ;;  %s1533_s24 = smov 0  }
   0x7 LB: > { %s1548_s25 = sadd.s32 4294967295, %s1482_s24   ;;  %s1273_s26 = sadd.s32 4294967294, %s1482_s24   ;;  %s1482_s24 = sphi %s1533_s24, %s2184_s24   ;;  %s1478_s23 = sphi %s1531_s23, %s2183_s23   ;;  %s1474_s22 = sphi %s1529_s22, %s2182_s22   ;;  %s1470_s21 = sphi %s1527_s21, %s2181_s21  }
   0x8   : > { %s1552_s27 = sadd.s32 1, %s1482_s24   ;;  %s33_s28 = sadd.s32 1, %s1478_s23 }
   0x9   : > { %s30_s29 = ssub.s32 %s1482_s24, %s1552_s27  ;;  %p40_p0 = scmp.ne.s32.totalorder %s1478_s23, %s1474_s22 }
   0xa   : > { %p31_p1 = scmp.eq.s32.totalorder %s30_s29, 0  ;;  %p41_p2 = scmp.eq.s32.totalorder %s1482_s24, 0 }
   0xb   : > { %p46_p3 = scmp.ne.s32.totalorder %s1474_s22, %s1470_s21  ;;  %p47_p4 = scmp.eq.s32.totalorder %s1548_s25, 0 }
   0xc   : > { %s1564_s30 = scalar_select %p31_p1, %s1478_s23, %s33_s28  }
   0xd   : > { %p42_p5 = por %p41_p2, %p40_p0  ;;  %p1566_p6 = por %p47_p4, %p46_p3 }
   0xe   : > { %p154_p7 = scmp.eq.s32.totalorder %s1548_s25, 1  ;;  %p160_p8 = scmp.eq.s32.totalorder %s1273_s26, 1 }
   0xf   : > { %s2159_s7 = scalar_select %p1566_p6, 1, 0 }
  0x10   : > { %p1311_p10 = scmp.lt.s32.totalorder %s1482_s24, 2  ;;  %p1573_p11 = por %p154_p7, %p40_p0 }
  0x11   : > { %p1577_p12 = por %p160_p8, %p46_p3  ;;  %s218_s10 = sand.u32 1, %s1478_s23  }
  0x12   : > { %s2160_s8 = scalar_select %p1573_p11, 1, 0 }
  0x13   : > { %s2161_s9 = scalar_select %p1577_p12, 1, 0 }
  0x14   : > { %s1289_s11 = sshll.u32 %s1482_s24, 8  ;;  %s1292_s12 = smul.u32 160, %s218_s10 }
  0x15   : > { %s1586_s15 = scalar_lea.hbm %s2137_s0, %s1289_s11  ;;  %p1588_p13 = pnand %p1311_p10, %p42_p5 }
  0x16   : > { %s222_s17 = scalar_lea.vmem [#allocation2], %s1292_s12  ;;  %s1595_s19 = scalar_lea.sflag [#allocation3], %s218_s10 }
  0x17   : > { %s229_s18 = sshll.u32 %s222_s17, 4  ;;  %s1360_s20 = scalar_lea.hbm %s1586_s15, 2560  ;;  %s1592_s18 = int_to_ptr.vmem [resolvable:$true] %s229_s18 }
  0x18   : > { %p1361_p1 = scmp.ne.s32.totalorder %s1586_s15, %s1360_s20  ;;  %p1362_p2 = pneg %p1588_p13 }
  0x19   : > { %s1365_s29 = scalar_lea.hbm %s2137_s0, 5120  ;;  %p1366_p5 = scmp.lt.s32.totalorder %s1586_s15, %s2137_s0 }
  0x1a   : > { %p1363_p3 = pnand %p1362_p2, %p1361_p1  ;;  %p1367_p7 = scmp.lt.s32.totalorder %s1365_s29, %s1360_s20 }
  0x1c   : > { %p1364_p4 = pneg %p1363_p3  ;;  %p1368_p8 = por %p1367_p7, %p1366_p5 }
  0x1e   : > { %p1369_p10 = pnand %p1368_p8, %p1364_p4 }
  0x20   : > { %1372 = shalt.err (!%p1369_p10)
}
  0x21   : > { %s1373_s10 = scalar_lea.vmem %s1592_s18, 2560  ;;  %s1484_s12 = smov [#allocation2]  }
  0x22   : > { %p1374_p9 = scmp.ne.s32.totalorder %s1592_s18, %s1373_s10  ;;  %s1378_s14 = sshll.u32 %s1484_s12, 4  ;;  %s1379_s14 = int_to_ptr.vmem [resolvable:$false] %s1378_s14 }
  0x23   : > { %s1380_s17 = scalar_lea.vmem %s1379_s14, 5120  ;;  %p1381_p3 = scmp.lt.s32.totalorder %s1592_s18, %s1379_s14 }
  0x24   : > { %p1376_p0 = pnand %p1374_p9, %p1362_p2  ;;  %p1382_p12 = scmp.lt.s32.totalorder %s1380_s17, %s1373_s10 }
  0x26   : > { %p1377_p1 = pneg %p1376_p0  ;;  %p1383_p11 = por %p1382_p12, %p1381_p3 }
  0x28   : > { %p1384_p6 = pnand %p1383_p11, %p1377_p1 }
  0x2a   : > { %1387 = shalt.err (!%p1384_p6)
}
  0x2b   : > { %s1485_s20 = smov 512   ;;  %s1486_s26 = smov 256  }
  0x2c   : > { %s1487_s28 = smov 16   ;;  %p237_p9 = scmp.lt.s32.totalorder %s1482_s24, 3 }
  0x2d   : > { %1303 = dma.hbm_to_vmem [thread:$0]  (!%p1588_p13), %s1586_s15, 2560, %s1592_s18, %s1595_s19, %s1485_s20, %s1486_s26, %s1487_s28  }
  0x2e   : > { %p2163_p0 = scmp.ge.s32.totalorder %s1482_s24, 1 }
  0x30   : > { %p238_p2 = pnand %p2163_p0, %p237_p9 }
  0x31   : > { %s1620_s29 = sand.u32 (!%p238_p2), 1, %s1474_s22   ;;  %p2164_p6 = scmp.ne.s32.totalorder (!%p238_p2), %s2159_s7, 0 }
  0x32   : > { %241 = sbr.rel (%p238_p2) target bundleno = 402 (0x192), region = 40  ;;  %s244_s13 = scalar_lea.sflag (!%p238_p2), [#allocation3], %s1620_s29 }
  0x33   : > { %s1293_s11 = smul.u32 (!%p238_p2), 160, %s1620_s29 }
  0x35   : > { %s1624_s10 = scalar_lea.vmem (!%p238_p2), [#allocation2], %s1293_s11 }
  0x37   : > { %1457 = dma.done.wait (%p2164_p6), %s244_s13, 2560  }
  0x38   : > { %1459 = vsyncadd (%p2164_p6), %s244_s13, 4294964736  ;;  %v1488_v0 = vmov 0.0   ;;  %v1489_v1 = vmov 0   ;;  %v305_v2 = vld [vmem:[%s1624_s10 + $0x98] sm:$0xff]  ;;  %v304_v3 = vld [vmem:[%s1624_s10 + $0x90] sm:$0xff]  ;;  %vm306_vm0 = vcmask 654336  }
  0x39   : > { %397 = vmatprep.mubr.f32.mxu0 %v1488_v0  ;;  %584 = vmatprep.mubr.f32.mxu1 %v1488_v0  ;;  %v303_v4 = vld [vmem:[%s1624_s10 + $0x88] sm:$0xff]  ;;  %v1635_v5 = vand.u32 4294901760, %v305_v2  ;;  %v1637_v6 = vand.u32 4294901760, %v304_v3  ;;  %v302_v8 = vld [vmem:[%s1624_s10 + $0x80] sm:$0xff]  ;;  %v301_v9 = vld [vmem:[%s1624_s10 + $0x78] sm:$0xff]  ;;  %s1279_s28 = sshll.u32 %s1620_s29, 4 }
  0x3a   : > { %1350 = vset.pattern.permute.xlu0 %v1489_v1  ;;  %1351 = vset.pattern.permute.xlu1 %v1489_v1  ;;  %v1639_v7 = vand.u32 4294901760, %v303_v4  ;;  %v300_v10 = vld [vmem:[%s1624_s10 + $0x70] sm:$0xff]  ;;  %v1644_v11 = vand.u32 4294901760, %v302_v8  ;;  %v1646_v12 = vand.u32 4294901760, %v301_v9  ;;  %v299_v14 = vld [vmem:[%s1624_s10 + $0x68] sm:$0xff]  ;;  %v298_v15 = vld [vmem:[%s1624_s10 + $0x60] sm:$0xff] }
  0x3b   : > { %v1648_v13 = vand.u32 4294901760, %v300_v10  ;;  %v1653_v16 = vld [vmem:[%s1624_s10 + $0x58] sm:$0xff]  ;;  %326 = vmatprep.subr.mxu0 %v1635_v5  ;;  %v1656_v17 = vand.u32 4294901760, %v299_v14  ;;  %v1658_v18 = vand.u32 4294901760, %v298_v15  ;;  %v1664_v20 = vsub.f32 %v305_v2, %v1635_v5  ;;  %v1667_v21 = vld [vmem:[%s1624_s10 + $0x50] sm:$0xff]  ;;  %v1670_v22 = vld [vmem:[%s1624_s10 + $0x48] sm:$0xff] }
  0x3c   : > { %v1661_v19 = vand.u32 4294901760, %v1653_v16  ;;  %v1673_v23 = vld [vmem:[%s1624_s10 + $0x40] sm:$0xff]  ;;  %328 = vmatpush1.msra.mxu0 %v1637_v6  ;;  %v1677_v24 = vand.u32 4294901760, %v1667_v21  ;;  %v1680_v25 = vsub.f32 %v304_v3, %v1637_v6  ;;  %v1683_v26 = vand.u32 4294901760, %v1670_v22  ;;  %v1689_v28 = vld [vmem:[%s1624_s10 + $0x38] sm:$0xff]  ;;  %v1692_v29 = vld [vmem:[%s1624_s10 + $0x30] sm:$0xff] }
  0x3d   : > { %v1686_v27 = vsub.f32 %v303_v4, %v1639_v7  ;;  %v1695_v30 = vld [vmem:[%s1624_s10 + $0x28] sm:$0xff]  ;;  %330 = vmatprep.subr.mxu0 %v1639_v7  ;;  %v434_v31 = vand.u32 4294901760, %v1664_v20  ;;  %v1700_v32 = vand.u32 4294901760, %v1673_v23  ;;  %v1703_v33 = vsub.f32 %v302_v8, %v1644_v11  ;;  %v1718_v39 = vld [vmem:[%s1624_s10 + $0x20] sm:$0xff]  ;;  %v1749_v50 = vld [vmem:[%s1624_s10 + $0x18] sm:$0xff]  ;;  %s1290_s11 = sshll.u32 %s1548_s25, 8 }
  0x3e   : > { %v1706_v34 = vand.u32 4294901760, %v1689_v28  ;;  %332 = vmatpush1.msra.mxu0 %v1644_v11  ;;  %v440_v35 = vand.u32 4294901760, %v1680_v25  ;;  %v1712_v37 = vsub.f32 %v301_v9, %v1646_v12  ;;  %v1715_v38 = vand.u32 4294901760, %v1692_v29  ;;  %v1081_v44 = vld [vmem:[%s2139_s2] sm:$0xff]  ;;  %v1760_v55 = vld [vmem:[%s1624_s10 + $0x10] sm:$0xff]  ;;  %v1768_v60 = vld [vmem:[%s1624_s10 + $0x8] sm:$0xff]  ;;  %s2066_s19 = scalar_lea.hbm %s2142_s5, %s1290_s11  ;;  %s2073_s14 = scalar_lea.hbm %s2143_s6, %s1290_s11 }
  0x3f   : > { %v446_v36 = vand.u32 4294901760, %v1686_v27  ;;  %334 = vmatprep.subr.mxu0 %v1646_v12  ;;  %v435_v40 = vsub.f32 %v1664_v20, %v434_v31  ;;  %v452_v41 = vand.u32 4294901760, %v1703_v33  ;;  %v1726_v42 = vsub.f32 %v300_v10, %v1648_v13  ;;  %v1106_v45 = vld [vmem:[%s2141_s4] sm:$0xff]  ;;  %1084 = vperm.xlu0 %1350, %v1081_v44   ;;  %s273_s13 = scalar_lea.vmem [#allocation5], %s1279_s28  ;;  %s280_s7 = scalar_lea.vmem [#allocation6], %s1279_s28 }
  0x40   : > { %v1729_v43 = vand.u32 4294901760, %v1695_v30  ;;  %336 = vmatpush1.msra.mxu0 %v1648_v13  ;;  %v441_v46 = vsub.f32 %v1680_v25, %v440_v35  ;;  %v458_v48 = vand.u32 4294901760, %v1712_v37  ;;  %v1746_v49 = vsub.f32 %v299_v14, %v1656_v17  ;;  %1116 = vperm.xlu1 %1351, %v1106_v45   ;;  %v1781_v2 = vld [vmem:[%s1624_s10] sm:$0xff]  ;;  %s1157_s10 = sshll.u32 %s273_s13, 4  ;;  %s1171_s15 = sshll.u32 %s280_s7, 4  ;;  %s2068_s10 = int_to_ptr.vmem [resolvable:$true] %s1157_s10  ;;  %s2075_s15 = int_to_ptr.vmem [resolvable:$true] %s1171_s15 }
  0x41   : > { %v447_v47 = vsub.f32 %v1686_v27, %v446_v36  ;;  %338 = vmatprep.subr.mxu0 %v1656_v17  ;;  %v436_v51 = vand.u32 4294901760, %v435_v40  ;;  %v453_v52 = vsub.f32 %v1703_v33, %v452_v41  ;;  %v2157_v53 = vand.u32 4294901760, %v1726_v42  ;;  %s1138_s17 = scalar_lea.sflag [#allocation4], %s1620_s29  ;;  %s1388_s20 = scalar_lea.vmem %s2068_s10, 256 }
  0x42   : > { %v1757_v54 = vand.u32 4294901760, %v1718_v39  ;;  %340 = vmatpush1.msra.mxu0 %v1658_v18  ;;  %v442_v56 = vand.u32 4294901760, %v441_v46  ;;  %v459_v58 = vsub.f32 %v1712_v37, %v458_v48  ;;  %v2154_v59 = vand.u32 4294901760, %v1746_v49  ;;  %p1389_p11 = scmp.ne.s32.totalorder %s2068_s10, %s1388_s20  ;;  %p2178_p12 = scmp.ne.s32.totalorder %s2160_s8, 0 }
  0x43   : > { %v448_v57 = vand.u32 4294901760, %v447_v47  ;;  %342 = vmatprep.subr.mxu0 %v1661_v19  ;;  %437 = vmatprep.subr.mxu1 %v436_v51  ;;  %v454_v61 = vand.u32 4294901760, %v453_v52  ;;  %v465_v62 = vsub.f32 %v1726_v42, %v2157_v53  ;;  %v1775_v63 = vsub.f32 %v298_v15, %v1658_v18  ;;  %s1490_s26 = smov [#allocation5]  }
  0x44   : > { %v1778_v1 = vand.u32 4294901760, %v1749_v50  ;;  %344 = vmatpush1.msra.mxu0 %v1677_v24  ;;  %443 = vmatpush1.msra.mxu1 %v442_v56  ;;  %v460_v3 = vand.u32 4294901760, %v459_v58  ;;  %v471_v4 = vsub.f32 %v1746_v49, %v2154_v59  ;;  %v1789_v8 = vsub.f32 %v1653_v16, %v1661_v19  ;;  %v284_v16 = vld [vmem:[%s2138_s1] sm:$0xff]  ;;  %p1390_p13 = pnand %p1389_p11, %p2178_p12  ;;  %s1392_s28 = sshll.u32 %s1490_s26, 4  ;;  %s1393_s28 = int_to_ptr.vmem [resolvable:$false] %s1392_s28 }
  0x45   : > { %v1792_v9 = vand.u32 4294901760, %v1760_v55  ;;  %346 = vmatprep.subr.mxu0 %v1683_v26  ;;  %449 = vmatprep.subr.mxu1 %v448_v57  ;;  %v466_v10 = vand.u32 4294901760, %v465_v62  ;;  %v2153_v14 = vand.u32 4294901760, %v1775_v63  ;;  %v1798_v15 = vsub.f32 %v1667_v21, %v1677_v24  ;;  %v1105_v56 = vld [vmem:[%s2140_s3] sm:$0xff]  ;;  %s1394_s16 = scalar_lea.vmem %s1393_s28, 512  ;;  %p1395_p5 = scmp.lt.s32.totalorder %s2068_s10, %s1393_s28 }
  0x46   : > { %v1801_v40 = vand.u32 4294901760, %v1768_v60  ;;  %348 = vmatpush1.msra.mxu0 %v1700_v32  ;;  %455 = vmatpush1.msra.mxu1 %v454_v61  ;;  %v472_v44 = vand.u32 4294901760, %v471_v4  ;;  %v2152_v45 = vand.u32 4294901760, %v1789_v8  ;;  %v1810_v46 = vsub.f32 %v1670_v22, %v1683_v26  ;;  %p1391_p4 = pneg %p1390_p13  ;;  %p1396_p7 = scmp.lt.s32.totalorder %s1394_s16, %s1388_s20 }
  0x47   : > { %v1813_v21 = vand.u32 4294901760, %v1781_v2  ;;  %350 = vmatprep.subr.mxu0 %v1706_v34  ;;  %461 = vmatprep.subr.mxu1 %v460_v3  ;;  %v477_v47 = vsub.f32 %v1775_v63, %v2153_v14  ;;  %v2146_v51 = vand.u32 4294901760, %v1798_v15  ;;  %v1822_v52 = vsub.f32 %v1673_v23, %v1700_v32 }
  0x48   : > { %v1826_v22 = vsub.f32 %v1689_v28, %v1706_v34  ;;  %352 = vmatpush1.msra.mxu0 %v1715_v38  ;;  %467 = vmatpush1.msra.mxu1 %v466_v10  ;;  %v483_v57 = vsub.f32 %v1789_v8, %v2152_v45  ;;  %v2147_v58 = vand.u32 4294901760, %v1810_v46  ;;  %v308_v23 = vsel %vm306_vm0, %v284_v16, 0  ;;  %p1397_p8 = por %p1396_p7, %p1395_p5 }
  0x49   : > { %v1839_v61 = vsub.f32 %v1692_v29, %v1715_v38  ;;  %354 = vmatprep.subr.mxu0 %v1729_v43  ;;  %473 = vmatprep.subr.mxu1 %v472_v44  ;;  %v478_v28 = vand.u32 4294901760, %v477_v47  ;;  %v489_v62 = vsub.f32 %v1798_v15, %v2146_v51  ;;  %v2148_v3 = vand.u32 4294901760, %v1822_v52 }
  0x4a   : > { %v2149_v4 = vand.u32 4294901760, %v1826_v22  ;;  %356 = vmatpush1.msra.mxu0 %v1757_v54  ;;  %v484_v10 = vand.u32 4294901760, %v483_v57  ;;  %v495_v29 = vsub.f32 %v1810_v46, %v2147_v58  ;;  %v1851_v16 = vand.u32 4294901760, %v308_v23  ;;  %1109 = vperm.xlu0 %1350, %v1105_v56   ;;  %p1398_p10 = pnand %p1397_p8, %p1391_p4 }
  0x4b   : > { %v2150_v44 = vand.u32 4294901760, %v1839_v61  ;;  %479 = vmatpush1.msra.mxu1 %v478_v28  ;;  %358 = vmatprep.subr.mxu0 %v1778_v1  ;;  %v490_v47 = vand.u32 4294901760, %v489_v62  ;;  %v501_v51 = vsub.f32 %v1822_v52, %v2148_v3  ;;  %v1863_v58 = vsub.f32 %v1695_v30, %v1729_v43 }
  0x4c   : > { %v507_v57 = vsub.f32 %v1826_v22, %v2149_v4  ;;  %485 = vmatprep.subr.mxu1 %v484_v10  ;;  %360 = vmatpush1.msra.mxu0 %v1792_v9  ;;  %v496_v56 = vand.u32 4294901760, %v495_v29  ;;  %v1867_v28 = vsub.f32 %v308_v23, %v1851_v16  ;;  %v1874_v3 = vsub.f32 %v1718_v39, %v1757_v54  ;;  %v285_v23 = vld [vmem:[%s2138_s1 + $0x8] sm:$0xff] }
  0x4d   : > { %v513_v62 = vsub.f32 %v1839_v61, %v2150_v44  ;;  %491 = vmatpush1.msra.mxu1 %v490_v47  ;;  %362 = vmatprep.subr.mxu0 %v1801_v40  ;;  %v502_v30 = vand.u32 4294901760, %v501_v51  ;;  %v2151_v10 = vand.u32 4294901760, %v1863_v58  ;;  %v1880_v29 = vsub.f32 %v1749_v50, %v1778_v1 }
  0x4e   : > { %v508_v4 = vand.u32 4294901760, %v507_v57  ;;  %497 = vmatprep.subr.mxu1 %v496_v56  ;;  %364 = vmatpush1.msra.mxu0 %v1813_v21  ;;  %v2155_v39 = vand.u32 4294901760, %v1867_v28  ;;  %v2156_v44 = vand.u32 4294901760, %v1874_v3  ;;  %v1890_v51 = vsub.f32 %v1760_v55, %v1792_v9 }
  0x4f   : > { %v514_v47 = vand.u32 4294901760, %v513_v62  ;;  %503 = vmatpush1.msra.mxu1 %v502_v30  ;;  %613 = vmatprep.subr.mxu0 %v1664_v20  ;;  %v519_v50 = vsub.f32 %v1863_v58, %v2151_v10  ;;  %v530_v57 = vand.u32 4294901760, %v1880_v29  ;;  %v1899_v56 = vsub.f32 %v1768_v60, %v1801_v40 }
  0x50   : > { %v1903_v62 = vsub.f32 %v1781_v2, %v1813_v21  ;;  %509 = vmatprep.subr.mxu1 %v508_v4  ;;  %v401_v55 = vsub.f32 %v1867_v28, %v2155_v39  ;;  %v525_v30 = vsub.f32 %v1874_v3, %v2156_v44  ;;  %v2158_v10 = vand.u32 4294901760, %v1890_v51 }
  0x51   : > { %v311_v45 = vsel %vm306_vm0, %v285_v23, 0  ;;  %515 = vmatpush1.msra.mxu1 %v514_v47  ;;  %v520_v60 = vand.u32 4294901760, %v519_v50  ;;  %v531_v2 = vsub.f32 %v1880_v29, %v530_v57  ;;  %v542_v4 = vand.u32 4294901760, %v1899_v56 }
  0x52   : > { %v548_v14 = vand.u32 4294901760, %v1903_v62  ;;  %v402_v59 = vand.u32 4294901760, %v401_v55  ;;  %v526_v39 = vand.u32 4294901760, %v525_v30  ;;  %v537_v44 = vsub.f32 %v1890_v51, %v2158_v10 }
  0x53   : > { %v1921_v53 = vand.u32 4294901760, %v311_v45  ;;  %521 = vmatprep.subr.mxu1 %v520_v60  ;;  %v532_v23 = vand.u32 4294901760, %v531_v2  ;;  %v543_v47 = vsub.f32 %v1899_v56, %v542_v4  ;;  %v2165_v20 = vand.u32 4294901760, %v1726_v42 }
  0x54   : > { %v549_v50 = vsub.f32 %v1903_v62, %v548_v14  ;;  %403 = vmatmul.mubr.f32.vlgmr.msra.gmra.mxu0 %v402_v59  ;;  %527 = vmatpush1.msra.mxu1 %v526_v39  ;;  %v538_v55 = vand.u32 4294901760, %v537_v44 }
  0x55   : > { %v1930_v30 = vsub.f32 %v311_v45, %v1921_v53  ;;  %616 = vmatpush1.msra.mxu0 %v1680_v25  ;;  %533 = vmatprep.subr.mxu1 %v532_v23  ;;  %v544_v10 = vand.u32 4294901760, %v543_v47  ;;  %v2166_v25 = vand.u32 4294901760, %v1746_v49 }
  0x56   : > { %v550_v60 = vand.u32 4294901760, %v549_v50  ;;  %619 = vmatprep.subr.mxu0 %v1686_v27  ;;  %539 = vmatpush1.msra.mxu1 %v538_v55  ;;  %v2167_v27 = vand.u32 4294901760, %v1775_v63 }
  0x57   : > { %622 = vmatpush1.msra.mxu0 %v1703_v33  ;;  %545 = vmatprep.subr.mxu1 %v544_v10  ;;  %v411_v59 = vand.u32 4294901760, %v1930_v30  ;;  %v2169_v33 = vand.u32 4294901760, %v1789_v8 }
  0x58   : > { %625 = vmatprep.subr.mxu0 %v1712_v37  ;;  %551 = vmatpush1.msra.mxu1 %v550_v60  ;;  %v2172_v37 = vand.u32 4294901760, %v1822_v52 }
  0x59   : > { %628 = vmatpush1.msra.mxu0 %v1726_v42  ;;  %586 = vmatmul.mubr.f32.vlgmr.msra.gmra.mxu1 %v1851_v16  ;;  %v412_v45 = vsub.f32 %v1930_v30, %v411_v59 }
  0x5a   : > { %631 = vmatprep.subr.mxu0 %v1746_v49  ;;  %733 = vmatprep.subr.mxu1 %v1635_v5 }
  0x5b   : > { %634 = vmatpush1.msra.mxu0 %v1775_v63  ;;  %735 = vmatpush1.msra.mxu1 %v1637_v6  ;;  %v413_v44 = vand.u32 4294901760, %v412_v45 }
  0x5c   : > { %637 = vmatprep.subr.mxu0 %v1789_v8  ;;  %737 = vmatprep.subr.mxu1 %v1639_v7 }
  0x5d   : > { %640 = vmatpush1.msra.mxu0 %v1798_v15  ;;  %739 = vmatpush1.msra.mxu1 %v1644_v11 }
  0x5e   : > { %643 = vmatprep.subr.mxu0 %v1810_v46  ;;  %741 = vmatprep.subr.mxu1 %v1646_v12 }
  0x5f   : > { %646 = vmatpush1.msra.mxu0 %v1822_v52  ;;  %743 = vmatpush1.msra.mxu1 %v1648_v13 }
  0x60   : > { %649 = vmatprep.subr.mxu0 %v1826_v22  ;;  %745 = vmatprep.subr.mxu1 %v1656_v17 }
  0x61   : > { %652 = vmatpush1.msra.mxu0 %v1839_v61  ;;  %408 = vmatprep.mubr.f32.mxu0 %v1488_v0 }
  0x62   : > { %655 = vmatprep.subr.mxu0 %v1863_v58  ;;  %747 = vmatpush1.msra.mxu1 %v1658_v18 }
  0x63   : > { %658 = vmatpush1.msra.mxu0 %v1874_v3  ;;  %749 = vmatprep.subr.mxu1 %v1661_v19 }
  0x64   : > { %414 = vmatmul.mubr.f32.gmra.mxu0 %v413_v44  ;;  %661 = vmatprep.subr.mxu0 %v1880_v29 }
  0x65   : > { %664 = vmatpush1.msra.mxu0 %v1890_v51  ;;  %751 = vmatpush1.msra.mxu1 %v1677_v24 }
  0x66   : > { %667 = vmatprep.subr.mxu0 %v1899_v56  ;;  %753 = vmatprep.subr.mxu1 %v1683_v26 }
  0x67   : > { %670 = vmatpush1.msra.mxu0 %v1903_v62  ;;  %703 = vmatprep.mubr.f32.mxu0 %v1488_v0 }
  0x68   : > { %755 = vmatpush1.msra.mxu1 %v1700_v32  ;;  %591 = vmatprep.mubr.f32.mxu1 %v1488_v0 }
  0x69   : > { %706 = vmatmul.mubr.f32.vlgmr.msra.gmra.mxu0 %v1867_v28  ;;  %757 = vmatprep.subr.mxu1 %v1706_v34 }
  0x6a   : > { %838 = vmatprep.subr.mxu0 %v434_v31  ;;  %593 = vmatmul.mubr.f32.gmra.mxu1 %v1921_v53  ;;  %v2168_v31 = vand.u32 4294901760, %v1867_v28 }
  0x6b   : > { %759 = vmatpush1.msra.mxu1 %v1715_v38  ;;  %842 = vmatpush1.msra.mxu0 %v440_v35  ;;  %v2170_v35 = vand.u32 4294901760, %v1798_v15 }
  0x6c   : > { %761 = vmatprep.subr.mxu1 %v1729_v43  ;;  %846 = vmatprep.subr.mxu0 %v446_v36  ;;  %v2171_v36 = vand.u32 4294901760, %v1810_v46 }
  0x6d   : > { %711 = vmatprep.mubr.f32.mxu0 %v1488_v0  ;;  %763 = vmatpush1.msra.mxu1 %v1757_v54 }
  0x6e   : > { %850 = vmatpush1.msra.mxu0 %v452_v41  ;;  %765 = vmatprep.subr.mxu1 %v1778_v1  ;;  %v2173_v41 = vand.u32 4294901760, %v1826_v22 }
  0x6f   : > { %714 = vmatmul.mubr.f32.gmra.mxu0 %v1930_v30  ;;  %854 = vmatprep.subr.mxu0 %v458_v48 }
  0x70   : > { %767 = vmatpush1.msra.mxu1 %v1792_v9  ;;  %858 = vmatpush1.msra.mxu0 %v2165_v20 }
  0x71   : > { %769 = vmatprep.subr.mxu1 %v1801_v40  ;;  %862 = vmatprep.subr.mxu0 %v2166_v25 }
  0x72   : > { %771 = vmatpush1.msra.mxu1 %v1813_v21  ;;  %804 = vmatprep.mubr.f32.mxu1 %v1488_v0 }
  0x73   : > { %866 = vmatpush1.msra.mxu0 %v2167_v27  ;;  %808 = vmatmul.mubr.f32.vlgmr.msra.gmra.mxu1 %v2168_v31 }
  0x74   : > { %870 = vmatprep.subr.mxu0 %v2169_v33  ;;  %975 = vmatprep.subr.mxu1 %v1635_v5  ;;  %v2174_v5 = vand.u32 4294901760, %v1839_v61 }
  0x75   : > { %874 = vmatpush1.msra.mxu0 %v2170_v35  ;;  %977 = vmatpush1.msra.mxu1 %v1637_v6  ;;  %v2175_v6 = vand.u32 4294901760, %v1863_v58 }
  0x76   : > { %878 = vmatprep.subr.mxu0 %v2171_v36  ;;  %979 = vmatprep.subr.mxu1 %v1639_v7  ;;  %v2176_v7 = vand.u32 4294901760, %v1874_v3 }
  0x77   : > { %813 = vmatprep.mubr.f32.mxu1 %v1488_v0  ;;  %882 = vmatpush1.msra.mxu0 %v2172_v37 }
  0x78   : > { %981 = vmatpush1.msra.mxu1 %v1644_v11  ;;  %886 = vmatprep.subr.mxu0 %v2173_v41  ;;  %v2177_v11 = vand.u32 4294901760, %v1890_v51 }
  0x79   : > { %817 = vmatmul.mubr.f32.gmra.mxu1 %v411_v59  ;;  %983 = vmatprep.subr.mxu1 %v1646_v12 }
  0x7a   : > { %890 = vmatpush1.msra.mxu0 %v2174_v5  ;;  %985 = vmatpush1.msra.mxu1 %v1648_v13 }
  0x7b   : > { %894 = vmatprep.subr.mxu0 %v2175_v6  ;;  %987 = vmatprep.subr.mxu1 %v1656_v17 }
  0x7c   : > { %898 = vmatpush1.msra.mxu0 %v2176_v7  ;;  %989 = vmatpush1.msra.mxu1 %v1658_v18 }
  0x7d   : > { %902 = vmatprep.subr.mxu0 %v530_v57  ;;  %991 = vmatprep.subr.mxu1 %v1661_v19 }
  0x7e   : > { %906 = vmatpush1.msra.mxu0 %v2177_v11  ;;  %993 = vmatpush1.msra.mxu1 %v1677_v24 }
  0x7f   : > { %910 = vmatprep.subr.mxu0 %v542_v4  ;;  %995 = vmatprep.subr.mxu1 %v1683_v26 }
  0x80   : > { %914 = vmatpush1.msra.mxu0 %v548_v14  ;;  %947 = vmatprep.mubr.f32.mxu0 %v1488_v0 }
  0x81   : > { %997 = vmatpush1.msra.mxu1 %v1700_v32  ;;  %949 = vmatmul.mubr.f32.vlgmr.msra.gmra.mxu0 %v1851_v16 }
  0x82   : > { %999 = vmatprep.subr.mxu1 %v1706_v34  ;;  %954 = vmatprep.mubr.f32.mxu0 %v1488_v0 }
  0x83   : > { %1001 = vmatpush1.msra.mxu1 %v1715_v38  ;;  %1046 = vmatprep.mubr.f32.mxu1 %v1488_v0 }
  0x84   : > { %1003 = vmatprep.subr.mxu1 %v1729_v43 }
  0x85   : > { %1005 = vmatpush1.msra.mxu1 %v1757_v54  ;;  %956 = vmatmul.mubr.f32.gmra.mxu0 %v1921_v53 }
  0x86   : > { %1007 = vmatprep.subr.mxu1 %v1778_v1 }
  0x87   : > { %1009 = vmatpush1.msra.mxu1 %v1792_v9 }
  0x88   : > { %1011 = vmatprep.subr.mxu1 %v1801_v40 }
  0x89   : > { %1013 = vmatpush1.msra.mxu1 %v1813_v21 }
  0x8a   : > { %1048 = vmatmul.mubr.f32.vlgmr.msra.gmra.mxu1 %v1851_v16 }
  0x8b   : > { %1053 = vmatprep.mubr.f32.mxu1 %v1488_v0 }
  0x8e   : > { %1055 = vmatmul.mubr.f32.gmra.mxu1 %v1921_v53 }
  0xba   : > { %v1085_v35 = vpop.permute.xlu0 %1084 }
  0xbb   : > { %v1117_v36 = vpop.permute.xlu1 %1116 }
  0xc5   : > { %v1110_v37 = vpop.permute.xlu0 %1109 }
 0x114   : > { %v404_v12 = vpop.f32.mrf.mxu0 }
 0x116   : > { %v406_v13 = vpop.f32.mrf.mxu0 }
 0x119   : > { %v587_v19 = vpop.f32.mrf.mxu1 }
 0x11a   : > { %v588_v63 = vadd.f32 %v587_v19, %v404_v12 }
 0x11b   : > { %v589_v26 = vpop.f32.mrf.mxu1 }
 0x11c   : > { %v590_v53 = vadd.f32 %v589_v26, %v406_v13 }
 0x124   : > { %v415_v17 = vpop.f32.mrf.mxu0 }
 0x126   : > { %v417_v18 = vpop.f32.mrf.mxu0 }
 0x129   : > { %v707_v24 = vpop.f32.mrf.mxu0 }
 0x12a   : > { %v594_v32 = vpop.f32.mrf.mxu1  ;;  %v708_v9 = vadd.f32 %v707_v24, %v588_v63 }
 0x12b   : > { %v709_v34 = vpop.f32.mrf.mxu0  ;;  %v595_v8 = vadd.f32 %v594_v32, %v415_v17 }
 0x12c   : > { %v596_v38 = vpop.f32.mrf.mxu1  ;;  %v710_v15 = vadd.f32 %v709_v34, %v590_v53 }
 0x12d   : > { %v597_v14 = vadd.f32 %v596_v38, %v417_v18 }
 0x12f   : > { %v715_v42 = vpop.f32.mrf.mxu0 }
 0x130   : > { %v716_v52 = vadd.f32 %v715_v42, %v595_v8 }
 0x131   : > { %v717_v48 = vpop.f32.mrf.mxu0 }
 0x132   : > { %v718_v3 = vadd.f32 %v717_v48, %v597_v14 }
 0x133   : > { %v809_v43 = vpop.f32.mrf.mxu1 }
 0x134   : > { %v810_v40 = vadd.f32 %v809_v43, %v708_v9 }
 0x135   : > { %v811_v49 = vpop.f32.mrf.mxu1 }
 0x136   : > { %v812_v22 = vadd.f32 %v811_v49, %v710_v15 }
 0x139   : > { %v818_v1 = vpop.f32.mrf.mxu1 }
 0x13a   : > { %v819_v16 = vadd.f32 %v818_v1, %v716_v52 }
 0x13b   : > { %v820_v46 = vpop.f32.mrf.mxu1 }
 0x13c   : > { %v821_v51 = vadd.f32 %v820_v46, %v718_v3 }
 0x141   : > { %v950_v54 = vpop.f32.mrf.mxu0 }
 0x142   : > { %v951_v58 = vadd.f32 %v950_v54, %v810_v40 }
 0x143   : > { %v952_v0 = vpop.f32.mrf.mxu0 }
 0x144   : > { %v953_v28 = vadd.f32 %v952_v0, %v812_v22 }
 0x145   : > { %v957_v21 = vpop.f32.mrf.mxu0 }
 0x146   : > { %v958_v57 = vadd.f32 %v957_v21, %v819_v16 }
 0x147   : > { %v959_v10 = vpop.f32.mrf.mxu0 }
 0x148   : > { %v960_v2 = vadd.f32 %v959_v10, %v821_v51 }
 0x14a   : > { %v1049_v61 = vpop.f32.mrf.mxu1 }
 0x14b   : > { %v1050_v29 = vadd.f32 %v1049_v61, %v951_v58 }
 0x14c   : > { %v1051_v39 = vpop.f32.mrf.mxu1 }
 0x14d   : > { %v1052_v56 = vadd.f32 %v1051_v39, %v953_v28  ;;  %v1061_v23 = vmul.f32 %v1050_v29, %v1050_v29  ;;  %v1129_v5 = vmul.f32 %v1117_v36, %v1050_v29  ;;  %v1112_v11 = vmul.f32 %v1110_v37, %v1050_v29 }
 0x14e   : > { %v1056_v62 = vpop.f32.mrf.mxu1 }
 0x14f   : > { %v1057_v4 = vadd.f32 %v1056_v62, %v958_v57  ;;  %v1062_v30 = vmul.f32 %v1052_v56, %v1052_v56  ;;  %v1113_v48 = vmul.f32 %v1110_v37, %v1052_v56  ;;  %v1130_v49 = vmul.f32 %v1117_v36, %v1052_v56 }
 0x150   : > { %v1058_v47 = vpop.f32.mrf.mxu1 }
 0x151   : > { %v1063_v50 = vmul.f32 %v1057_v4, %v1057_v4  ;;  %vm1089_vm1 = vcmp.lt.f32.partialorder %v1057_v4, 1e-08  ;;  %vm1091_vm2 = vcmp.gt.f32.partialorder %v1057_v4, -1e-08  ;;  %v1059_v55 = vadd.f32 %v1058_v47, %v960_v2 }
 0x152   : > { %vm1093_vm3 = vmand %vm1089_vm1, %vm1091_vm2 }
 0x153   : > { %v1065_v60 = vadd.f32 %v1063_v50, %v1061_v23  ;;  %v1095_v59 = vsel %vm1093_vm3, 1e-08, %v1057_v4  ;;  %v1064_v45 = vmul.f32 %v1059_v55, %v1059_v55  ;;  %vm1090_vm4 = vcmp.lt.f32.partialorder %v1059_v55, 1e-08 }
 0x154   : > { %v1097_v44 = vmul.f32 %v1095_v59, %v1095_v59  ;;  %vm1092_vm5 = vcmp.gt.f32.partialorder %v1059_v55, -1e-08  ;;  %v1119_v12 = vmul.f32 %v1117_v36, %v1095_v59  ;;  %v1127_v17 = vmul.f32 %v1110_v37, %v1095_v59 }
 0x155   : > { %1352 = vrsqrt.f32 %v1065_v60  ;;  %v1066_v20 = vadd.f32 %v1064_v45, %v1062_v30  ;;  %vm1094_vm6 = vmand %vm1090_vm4, %vm1092_vm5  ;;  %vm1069_vm7 = vcmp.eq.f32.partialorder %v1065_v60, inf  ;;  %v1072_v13 = vand.u32 2147483648, %v1065_v60 }
 0x156   : > { %v1096_v25 = vsel %vm1094_vm6, 1e-08, %v1059_v55  ;;  %v1099_v27 = vadd.f32 %v1097_v44, %v1061_v23  ;;  %vm1071_vm8 = vcmp.eq.f32.partialorder %v1065_v60, 0.0  ;;  %v1121_v63 = vsub.f32 %v1112_v11, %v1119_v12 }
 0x157   : > { %1354 = vrsqrt.f32 %v1066_v20  ;;  %v1098_v31 = vmul.f32 %v1096_v25, %v1096_v25  ;;  %v1120_v24 = vmul.f32 %v1117_v36, %v1096_v25  ;;  %vm1076_vm9 = vcmp.eq.f32.partialorder %v1066_v20, inf }
 0x158   : > { %1356 = vrsqrt.f32 %v1099_v27  ;;  %v1079_v32 = vand.u32 2147483648, %v1066_v20  ;;  %v1128_v34 = vmul.f32 %v1110_v37, %v1096_v25  ;;  %vm1078_vm10 = vcmp.eq.f32.partialorder %v1066_v20, 0.0 }
 0x159   : > { %v1100_v33 = vadd.f32 %v1098_v31, %v1062_v30  ;;  %v1131_v1 = vadd.f32 %v1129_v5, %v1127_v17  ;;  %v1122_v9 = vsub.f32 %v1113_v48, %v1120_v24 }
 0x15a   : > { %v1132_v14 = vadd.f32 %v1130_v49, %v1128_v34 }
 0x15b   : > { %1358 = vrsqrt.f32 %v1100_v33 }
 0x162   : > { %v1353_v41 = vpop.eup %1352 }
 0x163   : > { %v1068_v6 = vmul.f32 %v1353_v41, %v1065_v60 }
 0x164   : > { %v1355_v7 = vpop.eup %1354 }
 0x165   : > { %v1070_v18 = vsel %vm1069_vm7, %v1065_v60, %v1068_v6  ;;  %v1075_v19 = vmul.f32 %v1355_v7, %v1066_v20  ;;  %v1357_v43 = vpop.eup %1356 }
 0x166   : > { %v1073_v26 = vsel %vm1071_vm8, %v1072_v13, %v1070_v18 }
 0x167   : > { %v1077_v38 = vsel %vm1076_vm9, %v1066_v20, %v1075_v19  ;;  %v1087_v42 = vadd.f32 %v1085_v35, %v1073_v26 }
 0x168   : > { %v1080_v54 = vsel %vm1078_vm10, %v1079_v32, %v1077_v38  ;;  %v1359_v53 = vpop.eup %1358 }
 0x169   : > { %v1088_v0 = vadd.f32 %v1085_v35, %v1080_v54  ;;  %v1103_v8 = vmul.f32 %v1357_v43, %v1087_v42 }
 0x16b   : > { %v1104_v15 = vmul.f32 %v1359_v53, %v1088_v0  ;;  %v1123_v40 = vmul.f32 %v1121_v63, %v1103_v8  ;;  %v1133_v46 = vmul.f32 %v1131_v1, %v1103_v8 }
 0x16d   : > { %v1124_v21 = vmul.f32 %v1122_v9, %v1104_v15  ;;  %1125 = vst [vmem:[%s273_s13] sm:$0xff] %v1123_v40  ;;  %v1134_v52 = vmul.f32 %v1132_v14, %v1104_v15  ;;  %1135 = vst [vmem:[%s280_s7] sm:$0xff] %v1133_v46 }
 0x16f   : > { %1126 = vst [vmem:[%s273_s13 + $0x8] sm:$0xff] %v1124_v21  ;;  %1136 = vst [vmem:[%s280_s7 + $0x8] sm:$0xff] %v1134_v52 }
 0x170   : > { %1401 = shalt.err (!%p1398_p10)
}
 0x171   : > { %s1402_s11 = scalar_lea.hbm %s2066_s19, 256  ;;  %s1406_s18 = scalar_lea.hbm %s2142_s5, 512 }
 0x172   : > { %p1403_p1 = scmp.ne.s32.totalorder %s2066_s19, %s1402_s11  ;;  %p1407_p0 = scmp.lt.s32.totalorder %s2066_s19, %s2142_s5 }
 0x173   : > { %p1408_p2 = scmp.lt.s32.totalorder %s1406_s18, %s1402_s11 }
 0x174   : > { %p1404_p3 = pnand %p1403_p1, %p2178_p12 }
 0x175   : > { %p1409_p6 = por %p1408_p2, %p1407_p0 }
 0x176   : > { %p1405_p9 = pneg %p1404_p3 }
 0x178   : > { %p1410_p11 = pnand %p1409_p6, %p1405_p9 }
 0x17a   : > { %1413 = shalt.err (!%p1410_p11)
}
 0x17b   : > { %1296 = dma.vmem_to_hbm [thread:$0]  (%p2178_p12), %s2068_s10, 256, %s2066_s19, %s1138_s17  }
 0x17c   : > { %s1143_s20 = scalar_lea.sflag [#allocation7], %s1620_s29  ;;  %s1414_s26 = scalar_lea.vmem %s2075_s15, 256 }
 0x17d   : > { %p1415_p13 = scmp.ne.s32.totalorder %s2075_s15, %s1414_s26  ;;  %s1491_s28 = smov [#allocation6]  }
 0x17e   : > { %s1418_s16 = sshll.u32 %s1491_s28, 4  ;;  %s1419_s16 = int_to_ptr.vmem [resolvable:$false] %s1418_s16 }
 0x17f   : > { %p1416_p4 = pnand %p1415_p13, %p2178_p12  ;;  %s1420_s11 = scalar_lea.vmem %s1419_s16, 512 }
 0x180   : > { %p1421_p7 = scmp.lt.s32.totalorder %s2075_s15, %s1419_s16  ;;  %p1422_p8 = scmp.lt.s32.totalorder %s1420_s11, %s1414_s26 }
 0x181   : > { %p1417_p5 = pneg %p1416_p4 }
 0x182   : > { %p1423_p10 = por %p1422_p8, %p1421_p7 }
 0x184   : > { %p1424_p1 = pnand %p1423_p10, %p1417_p5 }
 0x186   : > { %1427 = shalt.err (!%p1424_p1)
}
 0x187   : > { %s1428_s10 = scalar_lea.hbm %s2073_s14, 256  ;;  %s1432_s17 = scalar_lea.hbm %s2143_s6, 512 }
 0x188   : > { %p1429_p3 = scmp.ne.s32.totalorder %s2073_s14, %s1428_s10  ;;  %p1433_p2 = scmp.lt.s32.totalorder %s2073_s14, %s2143_s6 }
 0x189   : > { %p1434_p6 = scmp.lt.s32.totalorder %s1432_s17, %s1428_s10 }
 0x18a   : > { %p1430_p9 = pnand %p1429_p3, %p2178_p12 }
 0x18b   : > { %p1435_p11 = por %p1434_p6, %p1433_p2 }
 0x18c   : > { %p1431_p0 = pneg %p1430_p9 }
 0x18e   : > { %p1436_p13 = pnand %p1435_p11, %p1431_p0 }
 0x190   : > { %1439 = shalt.err (!%p1436_p13)
}
 0x191   : > { %1297 = dma.vmem_to_hbm [thread:$0]  (%p2178_p12), %s2075_s15, 256, %s2073_s14, %s1143_s20  }
 0x192 PF: > { %s1183_s18 = sand.u32 1, %s1470_s21   ;;  %p2179_p4 = scmp.ne.s32.totalorder %s2161_s9, 0 }
 0x193   : > { %p2180_p5 = scmp.ge.s32.totalorder %s1482_s24, 2  ;;  %s1184_s25 = scalar_lea.sflag [#allocation4], %s1183_s18 }
 0x195   : > { %p1305_p7 = pnand %p2180_p5, %p2179_p4 }
 0x197   : > { %p1306_p8 = pneg %p1305_p7 }
 0x199   : > { %1461 = dma.done.wait (%p1306_p8), %s1184_s25, 256  }
 0x19a   : > { %1463 = vsyncadd (%p1306_p8), %s1184_s25, 4294967040  ;;  %s1193_s12 = scalar_lea.sflag [#allocation7], %s1183_s18 }
 0x19b   : > { %1465 = dma.done.wait (%p1306_p8), %s1193_s12, 256  }
 0x19c   : > { %1467 = vsyncadd (%p1306_p8), %s1193_s12, 4294967040  ;;  %p23_p12 = scmp.ge.s32.totalorder %s1552_s27, 4   ;;  %s2181_s21 = smov %s1474_s22 }
 0x19d   : > { %s2182_s22 = smov %s1478_s23  ;;  %s2183_s23 = smov %s1564_s30 }
 0x19e   : > { %s2184_s24 = smov %s1552_s27  ;;  %25 = sbr.rel (!%p23_p12) target bundleno = 7 (0x7), region = 102 }
 0x1a3   :  { %1198 = vsyncpa [#allocation3], 1 }
 0x1a4   :  { %1200 = vsyncpa [#allocation3 + $0x1], 1 }
 0x1a5   :  { %1201 = vsyncpa [#allocation4], 1 }
 0x1a6   :  { %1203 = vsyncpa [#allocation4 + $0x1], 1 }
 0x1a7   :  { %1204 = vsyncpa [#allocation7], 1 }
 0x1a8   :  { %1206 = vsyncpa [#allocation7 + $0x1], 1 }

</bundles_post_ra>
